<compile_context>
chip_gen: v7x
topology: tpu7x:2x2x1
jax: 0.10.0
libtpu: 0.0.40
codegen_flags: <defaults>
</compile_context>

<pallas_src>
import jax
import jax.numpy as jnp
from jax.experimental import pallas as pl
from jax.experimental.pallas import tpu as pltpu


def _prepend_kernel(t_ref, x_ref, o_ref):
    # Build the concatenated tile in registers and do ONE full-block store so
    # the output store stays unmasked even when T % 128 != 0.
    o_ref[...] = jnp.concatenate(
        [t_ref[...], x_ref[...].astype(o_ref.dtype)], axis=-1
    )


def _pick_row_tile(M: int, row_bytes: int, itemsize: int) -> int:
    """Largest row tile that (a) divides M, (b) is a multiple of the sublane
    packing for this dtype, and (c) keeps the per-step working set ~<= 8 MiB
    (so the double-buffered footprint stays well inside v7x's 64 MiB VMEM)."""
    sublane = {4: 8, 2: 16, 1: 32}.get(itemsize, 8)
    budget = 8 * 1024 * 1024  # single-buffer per-step working-set target
    max_tm = max(1, budget // max(1, row_bytes))
    if M <= max_tm:
        return M
    tm = (max_tm // sublane) * sublane
    while tm >= sublane:
        if M % tm == 0:
            return tm
        tm -= sublane
    return M  # full-extent rows are always a legal block shape


def tensor_prepend_encoder(tensor: jax.Array, x: jax.Array) -> jax.Array:
    """Prepend `tensor` (shape (1, M, T)) before `x` (shape (B, M, N)) on the last dim."""
    assert x.ndim == 3, "Only works with batched tensors"
    assert tensor.ndim == 3 and tensor.shape[0] == 1
    B, M, N = x.shape
    _, Mt, T = tensor.shape
    assert Mt == M, "row dimension of prepend tensor must match x"

    # torch.cat dtype-promotion semantics; cast only the tiny prepend buffer
    # outside the kernel (x is cast in-register inside the kernel, a no-op in
    # the common same-dtype case).
    out_dtype = jnp.result_type(tensor.dtype, x.dtype)
    tensor = tensor.astype(out_dtype)

    itemsize = jnp.dtype(out_dtype).itemsize
    # bytes per row of a tile: tensor (T) + x (N) + out (T + N) = 2*(T + N)
    row_bytes = itemsize * 2 * (T + N)
    tm = _pick_row_tile(M, row_bytes, itemsize)
    num_m_tiles = M // tm

    out_shape = jax.ShapeDtypeStruct((B, M, T + N), out_dtype)

    return pl.pallas_call(
        _prepend_kernel,
        out_shape=out_shape,
        grid_spec=pltpu.PrefetchScalarGridSpec(
            num_scalar_prefetch=0,
            # B innermost: the prepend-tensor block index is constant across
            # the inner loop, so it is only re-DMA'd once per M tile.
            grid=(num_m_tiles, B),
            in_specs=[
                pl.BlockSpec((1, tm, T), lambda j, b: (0, j, 0)),
                pl.BlockSpec((1, tm, N), lambda j, b: (b, j, 0)),
            ],
            out_specs=pl.BlockSpec((1, tm, T + N), lambda j, b: (b, j, 0)),
        ),
        compiler_params=pltpu.CompilerParams(
            dimension_semantics=("parallel", "parallel"),
            vmem_limit_bytes=32 * 1024 * 1024,
        ),
    )(tensor, x)


if __name__ == "__main__":
    key = jax.random.PRNGKey(0)
    k1, k2, k3, k4 = jax.random.split(key, 4)

    # Case 1: lane-aligned prepend length (T multiple of 128) -> fully
    # unmasked, lane-dense stores.
    B, M, T, N = 2, 32, 128, 384
    t1 = jax.random.normal(k1, (1, M, T), dtype=jnp.float32)
    x1 = jax.random.normal(k2, (B, M, N), dtype=jnp.float32)
    out1 = jax.block_until_ready(tensor_prepend_encoder(t1, x1))
    ref1 = jnp.concatenate([jnp.broadcast_to(t1, (B, M, T)), x1], axis=-1)
    assert out1.shape == (B, M, T + N)
    assert out1.dtype == ref1.dtype
    assert jnp.array_equal(out1, ref1), "mismatch vs reference (aligned case)"

    # Case 2: small, lane-unaligned T (like the original demo) -- the
    # in-register concat keeps the output store full-width and correct.
    B2, M2, T2, N2 = 2, 8, 4, 16
    t2 = jax.random.normal(k3, (1, M2, T2), dtype=jnp.float32)
    x2 = jax.random.normal(k4, (B2, M2, N2), dtype=jnp.float32)
    out2 = jax.block_until_ready(tensor_prepend_encoder(t2, x2))
    ref2 = jnp.concatenate([jnp.broadcast_to(t2, (B2, M2, T2)), x2], axis=-1)
    assert out2.shape == (B2, M2, T2 + N2)
    assert jnp.array_equal(out2, ref2), "mismatch vs reference (unaligned case)"

    print("KERNEL_OK")
</pallas_src>

<mosaic_0001>
module attributes {stable_mosaic.version = 11 : i64} {
  func.func @_prepend_kernel(%arg0: i32, %arg1: i32, %arg2: memref<1x32x128xf32, #tpu.memory_space<vmem>>, %arg3: memref<1x32x384xf32, #tpu.memory_space<vmem>>, %arg4: memref<1x32x512xf32, #tpu.memory_space<vmem>>) attributes {dimension_semantics = [#tpu.dimension_semantics<parallel>, #tpu.dimension_semantics<parallel>], iteration_bounds = array<i64: 1, 2>, scalar_prefetch = 0 : i64, scratch_operands = 0 : i64, tpu.core_type = #tpu.core_type<tc>, window_params = [{transform_indices = @transform_0, window_bounds = array<i64: 1, 32, 128>}, {transform_indices = @transform_1, window_bounds = array<i64: 1, 32, 384>}, {transform_indices = @transform_2, window_bounds = array<i64: 1, 32, 512>}]} {
    %c0 = arith.constant 0 : index
    %c0_0 = arith.constant 0 : index
    %c0_1 = arith.constant 0 : index
    %0 = vector.load %arg2[%c0, %c0_0, %c0_1] : memref<1x32x128xf32, #tpu.memory_space<vmem>>, vector<1x32x128xf32>
    %c0_2 = arith.constant 0 : index
    %c0_3 = arith.constant 0 : index
    %c0_4 = arith.constant 0 : index
    %1 = vector.load %arg3[%c0_2, %c0_3, %c0_4] : memref<1x32x384xf32, #tpu.memory_space<vmem>>, vector<1x32x384xf32>
    %2 = tpu.concatenate %0, %1 in 2 : vector<1x32x128xf32>, vector<1x32x384xf32> -> vector<1x32x512xf32>
    %c0_5 = arith.constant 0 : index
    %c0_6 = arith.constant 0 : index
    %c0_7 = arith.constant 0 : index
    %3 = vector.load %arg4[%c0_5, %c0_6, %c0_7] : memref<1x32x512xf32, #tpu.memory_space<vmem>>, vector<1x32x512xf32>
    tpu.vector_store %arg4[%c0_5, %c0_6, %c0_7], %2 {strides = array<i32>} : memref<1x32x512xf32, #tpu.memory_space<vmem>>, vector<1x32x512xf32>,
    return
  }
  func.func @transform_0(%arg0: i32, %arg1: i32) -> (i32, i32, i32) {
    %c0_i32 = arith.constant 0 : i32
    %c0_i32_0 = arith.constant 0 : i32
    %c0_i32_1 = arith.constant 0 : i32
    return %c0_i32, %arg0, %c0_i32_0 : i32, i32, i32
  }
  func.func @transform_1(%arg0: i32, %arg1: i32) -> (i32, i32, i32) {
    %c0_i32 = arith.constant 0 : i32
    %c0_i32_0 = arith.constant 0 : i32
    return %arg1, %arg0, %c0_i32 : i32, i32, i32
  }
  func.func @transform_2(%arg0: i32, %arg1: i32) -> (i32, i32, i32) {
    %c0_i32 = arith.constant 0 : i32
    %c0_i32_0 = arith.constant 0 : i32
    return %arg1, %arg0, %c0_i32 : i32, i32, i32
  }
}

</mosaic_0001>

<bundles_post_ra>
// kernel: tpu_custom_call.1
= control target key start
LH: loop header
LB: loop body
LE: loop exit
PB: predicated region body
PF: predicated region fallthrough
CT: control target
= control target key end

     0   :  { %7 = vsyncpa [#allocation3], 0  ;;  %s871_s0 = inlined_call_operand.hbm [shape: f32[1,32,128], index: 0, kind: input, shape index: {}]   ;;  %s872_s1 = inlined_call_operand.hbm [shape: f32[2,32,384], index: 1, kind: input, shape index: {}]   ;;  %s873_s2 = inlined_call_operand.hbm [shape: f32[2,32,512], index: 2, kind: output, shape index: {}]  }
   0x1   :  { %8 = vsyncpa [#allocation6], 0 }
   0x2   :  { %10 = vsyncpa [#allocation6 + $0x1], 0 }
   0x3   :  { %11 = vsyncpa [#allocation4], 0 }
   0x4   :  { %13 = vsyncpa [#allocation4 + $0x1], 0  ;;  %s624_s9 = smov 0   ;;  %s626_s10 = smov 0  }
   0x5   :  { %s628_s11 = smov 0   ;;  %s630_s12 = smov 0  }
   0x6   :  { %s632_s13 = smov 0   ;;  %s634_s14 = smov 0  }
   0x7 LB: > { %s357_s15 = sadd.s32 4294967295, %s598_s14   ;;  %s358_s16 = sadd.s32 4294967294, %s598_s14   ;;  %s598_s14 = sphi %s634_s14, %s19_s14   ;;  %s594_s13 = sphi %s632_s13, %s896_s13   ;;  %s590_s12 = sphi %s630_s12, %s895_s12   ;;  %s586_s11 = sphi %s628_s11, %s894_s11   ;;  %s582_s10 = sphi %s626_s10, %s893_s10   ;;  %s578_s9 = sphi %s624_s9, %s892_s9  }
   0x8   : > { %p79_p0 = scmp.ne.s32.totalorder %s582_s10, %s578_s9  ;;  %p658_p1 = scmp.eq.s32.totalorder %s357_s15, 0 }
   0x9   : > { %p662_p2 = scmp.eq.s32.totalorder %s357_s15, 1  ;;  %p111_p3 = scmp.eq.s32.totalorder %s358_s16, 1 }
   0xa   : > { %s878_s17 = scalar_select %p658_p1, 1, 0 }
   0xb   : > { %s879_s18 = scalar_select %p662_p2, 1, 0 }
   0xc   : > { %p668_p4 = por %p658_p1, %p79_p0  ;;  %p359_p5 = scmp.ge.s32.totalorder %s598_s14, 1 }
   0xd   : > { %p673_p6 = por %p111_p3, %p79_p0  ;;  %p118_p7 = scmp.lt.s32.totalorder %s598_s14, 3 }
   0xe   : > { %s880_s19 = scalar_select %p668_p4, 1, 0 }
   0xf   : > { %s881_s20 = scalar_select %p673_p6, 1, 0 }
  0x10   : > { %p678_p8 = pnand %p359_p5, %p118_p7  ;;  %s600_s22 = smov [#allocation2]  }
  0x11   : > { %s133_s23 = sshll.u32 %s600_s22, 4  ;;  %s28_s25 = sadd.s32 1, %s594_s13  ;;  %s134_s23 = int_to_ptr.vmem [resolvable:$true] %s133_s23 }
  0x12   : > { %s882_s21 = scalar_select %p678_p8, 1, 0 }
  0x13   : > { %p383_p9 = pneg %p678_p8  ;;  %s454_s28 = scalar_lea.hbm %s871_s0, 512 }
  0x14   : > { %p455_p12 = scmp.ne.s32.totalorder %s871_s0, %s454_s28  ;;  %p461_p5 = scmp.lt.u32.totalorder %s454_s28, %s871_s0 }
  0x15   : > { %p687_p11 = pnand %p383_p9, %p658_p1 }
  0x17   : > { %p456_p13 = pneg %p687_p11 }
  0x19   : > { %p457_p0 = pnand %p456_p13, %p455_p12 }
  0x1b   : > { %p458_p3 = pneg %p457_p0 }
  0x1d   : > { %p463_p7 = pnand %p461_p5, %p458_p3 }
  0x1f   : > { %466 = shalt.err (!%p463_p7)
}
  0x20   : > { %s467_s5 = scalar_lea.vmem %s134_s23, 512  ;;  %p475_p4 = scmp.lt.s32.totalorder %s134_s23, %s134_s23 }
  0x21   : > { %p468_p9 = scmp.ne.s32.totalorder %s134_s23, %s467_s5  ;;  %p476_p1 = scmp.lt.s32.totalorder %s467_s5, %s467_s5 }
  0x23   : > { %p470_p10 = pnand %p468_p9, %p456_p13  ;;  %p477_p8 = por %p476_p1, %p475_p4 }
  0x25   : > { %p471_p6 = pneg %p470_p10 }
  0x27   : > { %p478_p2 = pnand %p477_p8, %p471_p6 }
  0x29   : > { %481 = shalt.err (!%p478_p2)
}
  0x2a   : > { %s601_s6 = smov 128   ;;  %s602_s7 = smov 8  }
  0x2b   : > { %386 = dma.hbm_to_vmem [thread:$0]  (!%p687_p11), %s871_s0, 512, %s134_s23, [#allocation3], %s601_s6, %s601_s6, %s602_s7  }
  0x2c   : > { %p29_p1 = scmp.ge.s32.totalorder %s28_s25, 2  ;;  %s66_s16 = sadd.s32 1, %s586_s11 }
  0x2d   : > { %p73_p2 = scmp.ne.s32.totalorder %s586_s11, %s582_s10  ;;  %p74_p4 = scmp.eq.s32.totalorder %s598_s14, 0 }
  0x2e   : > { %s898_s25 = smov (%p29_p1, %s28_s25), 0  ;;  %p884_p8 = scmp.ne.s32.totalorder %s879_s18, 0 }
  0x2f   : > { %p75_p6 = por %p74_p4, %p73_p2  ;;  %s61_s26 = ssub.s32 %s594_s13, %s898_s25 }
  0x30   : > { %p716_p10 = por %p884_p8, %p73_p2  ;;  %p396_p12 = scmp.lt.s32.totalorder %s598_s14, 2 }
  0x31   : > { %p64_p13 = scmp.eq.s32.totalorder %s61_s26, 0  ;;  %s147_s24 = sand.u32 1, %s586_s11  }
  0x32   : > { %s372_s27 = smul.u32 96, %s147_s24  ;;  %p728_p11 = pnand %p396_p12, %p75_p6 }
  0x33   : > { %s725_s28 = scalar_select %p64_p13, %s586_s11, %s66_s16  }
  0x34   : > { %s373_s23 = smul.u32 1536, %s594_s13  ;;  %s151_s29 = scalar_lea.vmem [#allocation5], %s372_s27 }
  0x35   : > { %s161_s30 = sshll.u32 %s151_s29, 4  ;;  %s739_s6 = scalar_lea.sflag [#allocation6], %s147_s24  ;;  %s737_s30 = int_to_ptr.vmem [resolvable:$true] %s161_s30 }
  0x36   : > { %s735_s5 = scalar_lea.hbm %s872_s1, %s373_s23  ;;  %p484_p3 = pneg %p728_p11 }
  0x37   : > { %s482_s7 = scalar_lea.hbm %s735_s5, 1536  ;;  %s487_s16 = scalar_lea.hbm %s872_s1, 3072 }
  0x38   : > { %p483_p0 = scmp.ne.s32.totalorder %s735_s5, %s482_s7  ;;  %p488_p9 = scmp.lt.u32.totalorder %s735_s5, %s872_s1 }
  0x39   : > { %p489_p1 = scmp.lt.u32.totalorder %s487_s16, %s482_s7  ;;  %p491_p4 = scmp.lt.u32.totalorder %s482_s7, %s735_s5 }
  0x3a   : > { %p485_p5 = pnand %p484_p3, %p483_p0 }
  0x3b   : > { %p490_p2 = por %p489_p1, %p488_p9 }
  0x3c   : > { %p486_p7 = pneg %p485_p5 }
  0x3d   : > { %p492_p6 = por %p491_p4, %p490_p2 }
  0x3f   : > { %p493_p8 = pnand %p492_p6, %p486_p7 }
  0x41   : > { %496 = shalt.err (!%p493_p8)
}
  0x42   : > { %s497_s24 = scalar_lea.vmem %s737_s30, 1536  ;;  %s603_s23 = smov [#allocation5]  }
  0x43   : > { %p498_p12 = scmp.ne.s32.totalorder %s737_s30, %s497_s24  ;;  %s502_s29 = sshll.u32 %s603_s23, 4  ;;  %s503_s29 = int_to_ptr.vmem [resolvable:$false] %s502_s29 }
  0x44   : > { %s504_s4 = scalar_lea.vmem %s503_s29, 3072  ;;  %p505_p5 = scmp.lt.s32.totalorder %s737_s30, %s503_s29 }
  0x45   : > { %p500_p13 = pnand %p498_p12, %p484_p3  ;;  %p506_p9 = scmp.lt.s32.totalorder %s504_s4, %s497_s24 }
  0x47   : > { %p501_p0 = pneg %p500_p13  ;;  %p507_p1 = por %p506_p9, %p505_p5 }
  0x49   : > { %p508_p2 = pnand %p507_p1, %p501_p0 }
  0x4b   : > { %511 = shalt.err (!%p508_p2)
}
  0x4c   : > { %s604_s18 = smov 384   ;;  %s605_s7 = smov 24  }
  0x4d   : > { %390 = dma.hbm_to_vmem [thread:$0]  (!%p728_p11), %s735_s5, 1536, %s737_s30, %s739_s6, %s604_s18, %s604_s18, %s605_s7  }
  0x4e   : > { %p887_p3 = scmp.ne.s32.totalorder %s882_s21, 0 }
  0x4f   : > { %p888_p7 = scmp.ne.s32.totalorder (!%p887_p3), %s878_s17, 0 }
  0x50   : > { %173 = sbr.rel (%p887_p3) target bundleno = 119 (0x77), region = 28 }
  0x57   : > { %565 = dma.done.wait (%p888_p7), [#allocation3], 512  }
  0x58   : > { %567 = vsyncadd (%p888_p7), [#allocation3], 4294966784  ;;  %s774_s8 = sand.u32 1, %s582_s10   ;;  %p889_p11 = scmp.ne.s32.totalorder %s880_s19, 0 }
  0x59   : > { %s374_s15 = smul.u32 96, %s774_s8  ;;  %s180_s16 = scalar_lea.sflag [#allocation6], %s774_s8 }
  0x5b   : > { %s778_s26 = scalar_lea.vmem [#allocation5], %s374_s15 }
  0x5c   : > { %569 = dma.done.wait (%p889_p11), %s180_s16, 1536  }
  0x5d   : > { %571 = vsyncadd (%p889_p11), %s180_s16, 4294965760  ;;  %s365_s17 = sshll.u32 %s774_s8, 7  ;;  %v207_v0 = vld [vmem:[#allocation2] sm:$0xff]  ;;  %v212_v2 = vld [vmem:[%s778_s26 + $0x8] sm:$0xff]  ;;  %s371_s21 = sshll.u32 %s590_s12, 11 }
  0x5e   : > { %v211_v1 = vld [vmem:[%s778_s26] sm:$0xff]  ;;  %s788_s30 = scalar_lea.vmem [#allocation7], %s365_s17  ;;  %v213_v3 = vld [vmem:[%s778_s26 + $0x10] sm:$0xff]  ;;  %v208_v4 = vld [vmem:[#allocation2 + $0x8] sm:$0xff]  ;;  %s810_s5 = scalar_lea.hbm %s873_s2, %s371_s21 }
  0x5f   : > { %s256_s19 = sshll.u32 %s788_s30, 4  ;;  %223 = vst [vmem:[%s788_s30] sm:$0xff] %v207_v0  ;;  %224 = vst [vmem:[%s788_s30 + $0x8] sm:$0xff] %v211_v1  ;;  %v214_v5 = vld [vmem:[%s778_s26 + $0x18] sm:$0xff]  ;;  %v215_v6 = vld [vmem:[%s778_s26 + $0x20] sm:$0xff]  ;;  %s240_s6 = scalar_lea.sflag [#allocation4], %s774_s8  ;;  %s812_s19 = int_to_ptr.vmem [resolvable:$true] %s256_s19 }
  0x60   : > { %225 = vst [vmem:[%s788_s30 + $0x10] sm:$0xff] %v212_v2  ;;  %226 = vst [vmem:[%s788_s30 + $0x18] sm:$0xff] %v213_v3  ;;  %v216_v7 = vld [vmem:[%s778_s26 + $0x28] sm:$0xff]  ;;  %v209_v8 = vld [vmem:[#allocation2 + $0x10] sm:$0xff]  ;;  %s512_s27 = scalar_lea.vmem %s812_s19, 2048  ;;  %s606_s24 = smov [#allocation7]  }
  0x61   : > { %227 = vst [vmem:[%s788_s30 + $0x20] sm:$0xff] %v208_v4  ;;  %228 = vst [vmem:[%s788_s30 + $0x28] sm:$0xff] %v214_v5  ;;  %v217_v9 = vld [vmem:[%s778_s26 + $0x30] sm:$0xff]  ;;  %v218_v10 = vld [vmem:[%s778_s26 + $0x38] sm:$0xff]  ;;  %p513_p4 = scmp.ne.s32.totalorder %s812_s19, %s512_s27  ;;  %s516_s23 = sshll.u32 %s606_s24, 4  ;;  %s517_s23 = int_to_ptr.vmem [resolvable:$false] %s516_s23 }
  0x62   : > { %229 = vst [vmem:[%s788_s30 + $0x30] sm:$0xff] %v215_v6  ;;  %230 = vst [vmem:[%s788_s30 + $0x38] sm:$0xff] %v216_v7  ;;  %v219_v11 = vld [vmem:[%s778_s26 + $0x40] sm:$0xff]  ;;  %v210_v12 = vld [vmem:[#allocation2 + $0x18] sm:$0xff]  ;;  %s518_s29 = scalar_lea.vmem %s517_s23, 4096  ;;  %p519_p12 = scmp.lt.s32.totalorder %s812_s19, %s517_s23 }
  0x63   : > { %231 = vst [vmem:[%s788_s30 + $0x40] sm:$0xff] %v209_v8  ;;  %232 = vst [vmem:[%s788_s30 + $0x48] sm:$0xff] %v217_v9  ;;  %v220_v13 = vld [vmem:[%s778_s26 + $0x48] sm:$0xff]  ;;  %v221_v14 = vld [vmem:[%s778_s26 + $0x50] sm:$0xff]  ;;  %p514_p6 = pnand %p513_p4, %p716_p10  ;;  %p520_p13 = scmp.lt.s32.totalorder %s518_s29, %s512_s27 }
  0x64   : > { %233 = vst [vmem:[%s788_s30 + $0x50] sm:$0xff] %v218_v10  ;;  %234 = vst [vmem:[%s788_s30 + $0x58] sm:$0xff] %v219_v11  ;;  %v222_v15 = vld [vmem:[%s778_s26 + $0x58] sm:$0xff] }
  0x65   : > { %235 = vst [vmem:[%s788_s30 + $0x60] sm:$0xff] %v210_v12  ;;  %236 = vst [vmem:[%s788_s30 + $0x68] sm:$0xff] %v220_v13  ;;  %p515_p8 = pneg %p514_p6  ;;  %p521_p0 = por %p520_p13, %p519_p12 }
  0x66   : > { %237 = vst [vmem:[%s788_s30 + $0x70] sm:$0xff] %v221_v14  ;;  %238 = vst [vmem:[%s788_s30 + $0x78] sm:$0xff] %v222_v15 }
  0x67   : > { %p522_p5 = pnand %p521_p0, %p515_p8 }
  0x69   : > { %525 = shalt.err (!%p522_p5)
}
  0x6a   : > { %s526_s4 = scalar_lea.hbm %s810_s5, 2048  ;;  %s530_s15 = scalar_lea.hbm %s873_s2, 4096 }
  0x6b   : > { %p527_p9 = scmp.ne.s32.totalorder %s810_s5, %s526_s4  ;;  %p531_p3 = scmp.lt.u32.totalorder %s810_s5, %s873_s2 }
  0x6c   : > { %p532_p7 = scmp.lt.u32.totalorder %s530_s15, %s526_s4  ;;  %p534_p4 = scmp.lt.u32.totalorder %s526_s4, %s810_s5 }
  0x6d   : > { %p528_p1 = pnand %p527_p9, %p716_p10 }
  0x6e   : > { %p533_p11 = por %p532_p7, %p531_p3 }
  0x6f   : > { %p529_p2 = pneg %p528_p1 }
  0x70   : > { %p535_p6 = por %p534_p4, %p533_p11 }
  0x72   : > { %p536_p8 = pnand %p535_p6, %p529_p2 }
  0x74   : > { %539 = shalt.err (!%p536_p8)
}
  0x75   : > { %s607_s17 = smov 512   ;;  %s608_s21 = smov 32  }
  0x76   : > { %381 = dma.vmem_to_hbm [thread:$0]  (%p716_p10), %s812_s19, 2048, %s810_s5, %s240_s6, %s607_s17, %s607_s17, %s608_s21  }
  0x77 PF: > { %s271_s30 = sand.u32 1, %s578_s9   ;;  %p890_p12 = scmp.ne.s32.totalorder %s881_s20, 0 }
  0x78   : > { %p891_p13 = scmp.ge.s32.totalorder %s598_s14, 2  ;;  %s272_s12 = scalar_lea.sflag [#allocation4], %s271_s30 }
  0x7a   : > { %p392_p0 = pnand %p891_p13, %p890_p12 }
  0x7c   : > { %573 = dma.done.wait (!%p392_p0), %s272_s12, 2048  }
  0x7d   : > { %575 = vsyncadd (!%p392_p0), %s272_s12, 4294965248  ;;  %s19_s14 = sadd.s32 1, %s598_s14   ;;  %s892_s9 = smov %s582_s10 }
  0x7e   : > { %p16_p5 = scmp.ge.s32.totalorder %s19_s14, 4   ;;  %s893_s10 = smov %s586_s11 }
  0x7f   : > { %s894_s11 = smov %s725_s28  ;;  %s895_s12 = smov %s594_s13 }
  0x80   : > { %s896_s13 = smov %s898_s25  ;;  %18 = sbr.rel (!%p16_p5) target bundleno = 7 (0x7), region = 79 }
  0x87   :  { %277 = vsyncpa [#allocation3], 1 }
  0x88   :  { %279 = vsyncpa [#allocation3 + $0x1], 1 }
  0x89   :  { %280 = vsyncpa [#allocation6], 1 }
  0x8a   :  { %282 = vsyncpa [#allocation6 + $0x1], 1 }
  0x8b   :  { %283 = vsyncpa [#allocation4], 1 }
  0x8c   :  { %285 = vsyncpa [#allocation4 + $0x1], 1 }

</bundles_post_ra>
